<compile_context>
chip_gen: v5e
topology: v5e:2x2
jax: 0.10.0
libtpu: 0.0.40
codegen_flags: <defaults>
</compile_context>

<pallas_src>
import jax
import jax.numpy as jnp
from jax.experimental import pallas as pl
from jax.experimental.pallas import tpu as pltpu


def _make_se_kernel(inv_hw):
    inv_hw = float(inv_hw)   # compile-time constant: mean = sum * (1/HW)

    def se_kernel(x_ref, w1_ref, b1_ref, w2_ref, b2_ref, o_ref):
        nb, c, hw = x_ref.shape            # block shape, static at trace time

        # Loop invariants hoisted (JAX does not CSE broadcasts inside loops).
        ones = jnp.ones((hw, 1), dtype=x_ref.dtype)     # MXU reduction vector
        w1 = w1_ref[...]                                 # (Cr, C)
        b1 = b1_ref[...].astype(jnp.float32)             # (Cr, 1)
        w2 = w2_ref[...]                                 # (C, Cr)
        b2 = b2_ref[...].astype(jnp.float32)             # (C, 1)

        def body(i, carry):
            xi = x_ref[i]                                # (C, HW) native dtype

            # --- squeeze: global average pool via MXU ones-reduction -------
            # f32 accumulation inside the MXU; no f32 copy of the slab.
            pooled = jnp.dot(xi, ones,
                             preferred_element_type=jnp.float32) * inv_hw  # (C, 1)

            # --- excitation: 1x1 conv -> ReLU -> 1x1 conv -> sigmoid (f32) -
            h = jnp.dot(w1, pooled,
                        preferred_element_type=jnp.float32) + b1           # (Cr, 1)
            h = jnp.maximum(h, 0.0)
            s = jnp.dot(w2, h,
                        preferred_element_type=jnp.float32) + b2           # (C, 1)
            s = jax.nn.sigmoid(s)

            # --- scale: f32 multiply, single down-cast on the store --------
            # (C, 1) broadcast along the lane (HW) axis; per-sample f32 temp.
            o_ref[i] = (xi * s).astype(o_ref.dtype)
            return carry

        jax.lax.fori_loop(0, nb, body, 0)

    return se_kernel


def _vmem_budget_bytes():
    """Generation-aware scoped-VMEM budget for this kernel."""
    kind = ""
    try:
        kind = jax.devices()[0].device_kind.lower()
    except Exception:
        pass
    if "v7" in kind:
        return 48 << 20                # v7x: 64 MiB physical per TensorCore
    if any(tag in kind for tag in ("v4", "v5", "v6")):
        return 96 << 20                # 128 MiB physical VMEM
    return 32 << 20                    # unknown / older parts: conservative


def _pick_batch_tile(n, max_nb):
    """Largest divisor of n that is <= max_nb; prefer an even grid length
    (balanced across v7x's 2 TensorCores) if it costs < 2x in block size."""
    max_nb = int(max(1, min(n, max_nb)))
    divisors = [d for d in range(max_nb, 0, -1) if n % d == 0]
    best = divisors[0]
    for d in divisors:
        if (n // d) % 2 == 0 and 2 * d >= best:
            return d
    return best


def se_layer(x_nchw, w1, b1, w2, b2):
    """x_nchw: (N, C, H, W).  w1: (Cr, C) conv1 weight, b1: (Cr,),
    w2: (C, Cr) conv2 weight, b2: (C,).  Returns (N, C, H, W)."""
    N, C, H, W = x_nchw.shape
    Cr = w1.shape[0]
    HW = H * W

    # Free reshape (contiguous NCHW -> (N, C, HW)); no wrapper transposes.
    x3 = x_nchw.reshape(N, C, HW)
    b1_c = b1.reshape(Cr, 1)
    b2_c = b2.reshape(C, 1)

    itemsize = jnp.dtype(x_nchw.dtype).itemsize
    per_sample_io = C * HW * itemsize        # one x (or out) row of a block
    per_sample_f32 = C * HW * 4              # per-sample f32 scale temporary
    weights_bytes = 2 * sum(                 # double-buffered by the pipeline
        int(a.size) * jnp.dtype(a.dtype).itemsize for a in (w1, b1_c, w2, b2_c))

    budget = _vmem_budget_bytes()
    # Fixed VMEM that does not scale with Nb: weights, per-sample f32 temps
    # (the in-kernel loop reuses one buffer), compiler scratch / slack.
    fixed = weights_bytes + 2 * per_sample_f32 + (4 << 20)
    usable_for_blocks = max(budget - fixed, 4 * per_sample_io)

    # Double-buffered input + output blocks: 4 * Nb * per_sample_io bytes.
    max_nb_vmem = max(1, usable_for_blocks // (4 * per_sample_io))
    max_nb_block = max(1, (16 << 20) // per_sample_io)   # ~16 MiB block target
    max_nb_grid = max(1, N // 2)             # keep grid >= 2 for pipelining
    Nb = _pick_batch_tile(N, min(N, max_nb_vmem, max_nb_block, max_nb_grid))
    grid = (N // Nb,)

    needed = 4 * Nb * per_sample_io + fixed
    vmem_limit = int(min(budget, max(needed, 32 << 20)))

    out3 = pl.pallas_call(
        _make_se_kernel(1.0 / HW),
        out_shape=jax.ShapeDtypeStruct((N, C, HW), x_nchw.dtype),
        grid_spec=pltpu.PrefetchScalarGridSpec(
            num_scalar_prefetch=0,
            grid=grid,
            in_specs=[
                pl.BlockSpec((Nb, C, HW), lambda n: (n, 0, 0)),   # x batch tile
                pl.BlockSpec((Cr, C), lambda n: (0, 0)),          # W1
                pl.BlockSpec((Cr, 1), lambda n: (0, 0)),          # b1 (column)
                pl.BlockSpec((C, Cr), lambda n: (0, 0)),          # W2
                pl.BlockSpec((C, 1), lambda n: (0, 0)),           # b2 (column)
            ],
            out_specs=pl.BlockSpec((Nb, C, HW), lambda n: (n, 0, 0)),
        ),
        compiler_params=pltpu.CompilerParams(
            dimension_semantics=("parallel",),   # shard batch tiles over TCs
            vmem_limit_bytes=vmem_limit,
        ),
    )(x3, w1, b1_c, w2, b2_c)

    return out3.reshape(N, C, H, W)


def se_layer_ref(x, w1, b1, w2, b2):
    """Pure-JAX reference matching the PyTorch SELayer forward."""
    pooled = jnp.mean(x, axis=(2, 3), keepdims=True)              # (N, C, 1, 1)
    y = jnp.einsum('nchw,oc->nohw', pooled, w1) + b1[None, :, None, None]
    y = jnp.maximum(y, 0.0)
    y = jnp.einsum('nchw,oc->nohw', y, w2) + b2[None, :, None, None]
    y = jax.nn.sigmoid(y)
    return x * y


if __name__ == "__main__":
    # Small shapes consistent with the module: channel=4, reduction=4.
    N, C, H, W = 2, 4, 16, 16
    reduction = 4
    Cr = C // reduction

    key = jax.random.PRNGKey(0)
    kx, k1, k2, k3, k4 = jax.random.split(key, 5)

    x = jax.random.normal(kx, (N, C, H, W), dtype=jnp.float32)
    # Deterministic synthetic parameters (1x1 convs -> plain matrices).
    w1 = jax.random.normal(k1, (Cr, C), dtype=jnp.float32) * 0.5
    b1 = jax.random.normal(k2, (Cr,), dtype=jnp.float32) * 0.1
    w2 = jax.random.normal(k3, (C, Cr), dtype=jnp.float32) * 0.5
    b2 = jax.random.normal(k4, (C,), dtype=jnp.float32) * 0.1

    out = se_layer(x, w1, b1, w2, b2)
    out = jax.block_until_ready(out)

    ref = se_layer_ref(x, w1, b1, w2, b2)
    assert out.shape == (N, C, H, W)
    assert jnp.allclose(out, ref, atol=1e-5, rtol=1e-5), "mismatch vs reference"

    print("KERNEL_OK")
</pallas_src>

<mosaic_0001>
module attributes {stable_mosaic.version = 11 : i64} {
  func.func @se_kernel(%arg0: i32, %arg1: memref<1x4x256xf32, #tpu.memory_space<vmem>>, %arg2: memref<1x4xf32, #tpu.memory_space<vmem>>, %arg3: memref<1x1xf32, #tpu.memory_space<vmem>>, %arg4: memref<4x1xf32, #tpu.memory_space<vmem>>, %arg5: memref<4x1xf32, #tpu.memory_space<vmem>>, %arg6: memref<1x4x256xf32, #tpu.memory_space<vmem>>) attributes {dimension_semantics = [#tpu.dimension_semantics<parallel>], iteration_bounds = array<i64: 2>, scalar_prefetch = 0 : i64, scratch_operands = 0 : i64, tpu.core_type = #tpu.core_type<tc>, window_params = [{transform_indices = @transform_0, window_bounds = array<i64: 1, 4, 256>}, {pipeline_mode = #tpu.pipeline_mode<synchronous>, transform_indices = @transform_1, window_bounds = array<i64: 1, 4>}, {pipeline_mode = #tpu.pipeline_mode<synchronous>, transform_indices = @transform_2, window_bounds = array<i64: 1, 1>}, {pipeline_mode = #tpu.pipeline_mode<synchronous>, transform_indices = @transform_3, window_bounds = array<i64: 4, 1>}, {pipeline_mode = #tpu.pipeline_mode<synchronous>, transform_indices = @transform_4, window_bounds = array<i64: 4, 1>}, {transform_indices = @transform_5, window_bounds = array<i64: 1, 4, 256>}]} {
    %cst = arith.constant 1.000000e+00 : f32
    %0 = vector.broadcast %cst : f32 to vector<256x1xf32>
    %c0 = arith.constant 0 : index
    %c0_0 = arith.constant 0 : index
    %1 = vector.load %arg2[%c0, %c0_0] : memref<1x4xf32, #tpu.memory_space<vmem>>, vector<1x4xf32>
    %c0_1 = arith.constant 0 : index
    %c0_2 = arith.constant 0 : index
    %2 = vector.load %arg3[%c0_1, %c0_2] : memref<1x1xf32, #tpu.memory_space<vmem>>, vector<1x1xf32>
    %c0_3 = arith.constant 0 : index
    %c0_4 = arith.constant 0 : index
    %3 = vector.load %arg4[%c0_3, %c0_4] : memref<4x1xf32, #tpu.memory_space<vmem>>, vector<4x1xf32>
    %c0_5 = arith.constant 0 : index
    %c0_6 = arith.constant 0 : index
    %4 = vector.load %arg5[%c0_5, %c0_6] : memref<4x1xf32, #tpu.memory_space<vmem>>, vector<4x1xf32>
    %c0_i32 = arith.constant 0 : i32
    %5 = arith.index_cast %c0_i32 : i32 to index
    %c0_7 = arith.constant 0 : index
    %c0_8 = arith.constant 0 : index
    %6 = vector.load %arg1[%5, %c0_7, %c0_8] : memref<1x4x256xf32, #tpu.memory_space<vmem>>, vector<1x4x256xf32>
    %7 = vector.shape_cast %6 : vector<1x4x256xf32> to vector<4x256xf32>
    %cst_9 = arith.constant dense<0.000000e+00> : vector<4x1xf32>
    %8 = tpu.matmul %7, %0, %cst_9 {dimension_numbers = #tpu.dot_dimension_numbers<[1], [0], [0], [1], [0, 0, 1, 1], [], []>} : vector<4x256xf32>, vector<256x1xf32>, vector<4x1xf32> -> vector<4x1xf32>
    %cst_10 = arith.constant 3.906250e-03 : f32
    %9 = vector.broadcast %cst_10 : f32 to vector<4x1xf32>
    %10 = arith.mulf %8, %9 : vector<4x1xf32>
    %cst_11 = arith.constant dense<0.000000e+00> : vector<1x1xf32>
    %11 = tpu.matmul %1, %10, %cst_11 {dimension_numbers = #tpu.dot_dimension_numbers<[1], [0], [0], [1], [0, 0, 1, 1], [], []>} : vector<1x4xf32>, vector<4x1xf32>, vector<1x1xf32> -> vector<1x1xf32>
    %12 = arith.addf %11, %2 : vector<1x1xf32>
    %cst_12 = arith.constant 0.000000e+00 : f32
    %13 = vector.broadcast %cst_12 : f32 to vector<1x1xf32>
    %14 = arith.maximumf %12, %13 : vector<1x1xf32>
    %cst_13 = arith.constant dense<0.000000e+00> : vector<4x1xf32>
    %15 = tpu.matmul %3, %14, %cst_13 {dimension_numbers = #tpu.dot_dimension_numbers<[1], [0], [0], [1], [0, 0, 1, 1], [], []>} : vector<4x1xf32>, vector<1x1xf32>, vector<4x1xf32> -> vector<4x1xf32>
    %16 = arith.addf %15, %4 : vector<4x1xf32>
    %17 = arith.negf %16 : vector<4x1xf32>
    %18 = math.exp %17 : vector<4x1xf32>
    %cst_14 = arith.constant 1.000000e+00 : f32
    %19 = vector.broadcast %cst_14 : f32 to vector<4x1xf32>
    %20 = arith.addf %19, %18 : vector<4x1xf32>
    %21 = arith.divf %19, %20 : vector<4x1xf32>
    %22 = vector.broadcast %21 : vector<4x1xf32> to vector<4x256xf32>
    %23 = arith.mulf %7, %22 : vector<4x256xf32>
    %24 = arith.index_cast %c0_i32 : i32 to index
    %c0_15 = arith.constant 0 : index
    %c0_16 = arith.constant 0 : index
    %25 = vector.load %arg6[%24, %c0_15, %c0_16] : memref<1x4x256xf32, #tpu.memory_space<vmem>>, vector<1x4x256xf32>
    %26 = vector.shape_cast %25 : vector<1x4x256xf32> to vector<4x256xf32>
    %27 = vector.shape_cast %23 : vector<4x256xf32> to vector<1x4x256xf32>
    tpu.vector_store %arg6[%24, %c0_15, %c0_16], %27 {strides = array<i32>} : memref<1x4x256xf32, #tpu.memory_space<vmem>>, vector<1x4x256xf32>,
    %c1_i32 = arith.constant 1 : i32
    return
  }
  func.func @transform_0(%arg0: i32) -> (i32, i32, i32) {
    %c0_i32 = arith.constant 0 : i32
    %c0_i32_0 = arith.constant 0 : i32
    %c0_i32_1 = arith.constant 0 : i32
    return %arg0, %c0_i32, %c0_i32_0 : i32, i32, i32
  }
  func.func @transform_1(%arg0: i32) -> (i32, i32) {
    %c0_i32 = arith.constant 0 : i32
    %c0_i32_0 = arith.constant 0 : i32
    %c0_i32_1 = arith.constant 0 : i32
    return %c0_i32, %c0_i32_0 : i32, i32
  }
  func.func @transform_2(%arg0: i32) -> (i32, i32) {
    %c0_i32 = arith.constant 0 : i32
    %c0_i32_0 = arith.constant 0 : i32
    %c0_i32_1 = arith.constant 0 : i32
    return %c0_i32, %c0_i32_0 : i32, i32
  }
  func.func @transform_3(%arg0: i32) -> (i32, i32) {
    %c0_i32 = arith.constant 0 : i32
    %c0_i32_0 = arith.constant 0 : i32
    %c0_i32_1 = arith.constant 0 : i32
    return %c0_i32, %c0_i32_0 : i32, i32
  }
  func.func @transform_4(%arg0: i32) -> (i32, i32) {
    %c0_i32 = arith.constant 0 : i32
    %c0_i32_0 = arith.constant 0 : i32
    %c0_i32_1 = arith.constant 0 : i32
    return %c0_i32, %c0_i32_0 : i32, i32
  }
  func.func @transform_5(%arg0: i32) -> (i32, i32, i32) {
    %c0_i32 = arith.constant 0 : i32
    %c0_i32_0 = arith.constant 0 : i32
    %c0_i32_1 = arith.constant 0 : i32
    return %arg0, %c0_i32, %c0_i32_0 : i32, i32, i32
  }
}

</mosaic_0001>

<bundles_post_ra>
// kernel: tpu_custom_call.1
= control target key start
LH: loop header
LB: loop body
LE: loop exit
PB: predicated region body
PF: predicated region fallthrough
CT: control target
= control target key end

     0   :  { %s824_s0 = inlined_call_operand.hbm [shape: f32[2,4,256], index: 0, kind: input, shape index: {}]   ;;  %s825_s1 = inlined_call_operand.vmem [shape: f32[1,4], index: 1, kind: input, shape index: {}]   ;;  %s826_s2 = inlined_call_operand.<no memory space> [shape: f32[1,1], index: 2, kind: input, shape index: {}]   ;;  %s827_s3 = inlined_call_operand.vmem [shape: f32[4,1], index: 3, kind: input, shape index: {}]   ;;  %s828_s4 = inlined_call_operand.vmem [shape: f32[4,1], index: 4, kind: input, shape index: {}]   ;;  %s829_s5 = inlined_call_operand.hbm [shape: f32[2,4,256], index: 5, kind: output, shape index: {}]  }
   0x1   :  { %v10_v0 = vstv %s826_s2 }
   0x2   :  { %11 = vst [vmem:[#allocation2] sm:$0x1] %v10_v0 }
   0x3   :  { %12 = vsyncpa [#allocation4], 0 }
   0x4   :  { %14 = vsyncpa [#allocation4 + $0x1], 0 }
   0x5   :  { %15 = vsyncpa [#allocation5], 0 }
   0x6   :  { %17 = vsyncpa [#allocation5 + $0x1], 0  ;;  %s680_s20 = smov 0   ;;  %s682_s21 = smov 0  }
   0x7   :  { %s684_s22 = smov 0   ;;  %s686_s23 = smov 0  }
   0x8 LB: > { %s701_s2 = sadd.s32 4294967295, %s642_s23   ;;  %s471_s24 = sadd.s32 4294967294, %s642_s23   ;;  %s642_s23 = sphi %s686_s23, %s839_s23   ;;  %s638_s22 = sphi %s684_s22, %s838_s22   ;;  %s634_s21 = sphi %s682_s21, %s837_s21   ;;  %s630_s20 = sphi %s680_s20, %s836_s20  }
   0x9   : > { %s705_s25 = sadd.s32 1, %s642_s23   ;;  %s30_s26 = sadd.s32 1, %s638_s22 }
   0xa   : > { %s27_s27 = ssub.s32 %s642_s23, %s705_s25  ;;  %p37_p0 = scmp.ne.s32.totalorder %s638_s22, %s634_s21 }
   0xb   : > { %p28_p1 = scmp.eq.s32.totalorder %s27_s27, 0  ;;  %p38_p2 = scmp.eq.s32.totalorder %s642_s23, 0 }
   0xc   : > { %p43_p3 = scmp.ne.s32.totalorder %s634_s21, %s630_s20  ;;  %p44_p4 = scmp.eq.s32.totalorder %s701_s2, 0 }
   0xd   : > { %s717_s28 = scalar_select %p28_p1, %s638_s22, %s30_s26  }
   0xe   : > { %p719_p5 = por %p38_p2, %p37_p0  ;;  %p723_p6 = por %p44_p4, %p43_p3 }
   0xf   : > { %p151_p7 = scmp.eq.s32.totalorder %s701_s2, 1  ;;  %p157_p8 = scmp.eq.s32.totalorder %s471_s24, 1 }
  0x10   : > { %p504_p10 = scmp.lt.s32.totalorder %s642_s23, 2  ;;  %s189_s8 = sand.u32 1, %s638_s22  }
  0x11   : > { %p730_p11 = por %p151_p7, %p37_p0  ;;  %p734_p12 = por %p157_p8, %p43_p3 }
  0x12   : > { %s490_s9 = sshll.u32 %s642_s23, 3  ;;  %s474_s10 = sshll.u32 %s189_s8, 3 }
  0x13   : > { %s198_s13 = scalar_lea.hbm %s824_s0, %s490_s9  ;;  %s193_s15 = scalar_lea.vmem [#allocation3], %s474_s10 }
  0x14   : > { %s200_s14 = sshll.u32 %s198_s13, 4  ;;  %s202_s16 = sshll.u32 %s193_s15, 4  ;;  %s201_s14 = int_to_ptr.hbm [resolvable:$true] %s200_s14  ;;  %s203_s16 = int_to_ptr.vmem [resolvable:$true] %s202_s16 }
  0x15   : > { %p745_p13 = pnand %p504_p10, %p719_p5  ;;  %p477_p0 = scmp.ge.s32.totalorder %s642_s23, 1 }
  0x16   : > { %p207_p1 = scmp.lt.s32.totalorder %s642_s23, 3  ;;  %s190_s18 = scalar_lea.sflag [#allocation4], %s189_s8 }
  0x17   : > { %s546_s19 = sshra.s32 %s201_s14, 4  ;;  %p550_p3 = pneg %p745_p13  ;;  %s547_s19 = int_to_ptr.hbm [resolvable:$true] %s546_s19 }
  0x18   : > { %s548_s24 = scalar_lea.hbm %s547_s19, 8  ;;  %s553_s29 = scalar_lea.hbm %s824_s0, 16 }
  0x19   : > { %p549_p2 = scmp.ne.s32.totalorder %s547_s19, %s548_s24  ;;  %p554_p5 = scmp.lt.s32.totalorder %s547_s19, %s824_s0 }
  0x1a   : > { %p555_p8 = scmp.lt.s32.totalorder %s553_s29, %s548_s24 }
  0x1b   : > { %p551_p4 = pnand %p550_p3, %p549_p2 }
  0x1c   : > { %p556_p10 = por %p555_p8, %p554_p5 }
  0x1d   : > { %p552_p7 = pneg %p551_p4 }
  0x1f   : > { %p557_p9 = pnand %p556_p10, %p552_p7 }
  0x21   : > { %560 = shalt.err (!%p557_p9)
}
  0x22   : > { %499 = dma.hbm_to_vmem [thread:$0]  (!%p745_p13), %s201_s14, 128, %s203_s16, %s190_s18  }
  0x23   : > { %p208_p2 = pnand %p477_p0, %p207_p1 }
  0x24   : > { %s766_s8 = sand.u32 (!%p208_p2), 1, %s634_s21  }
  0x25   : > { %211 = sbr.rel (%p208_p2) target bundleno = 627 (0x273), region = 40  ;;  %s478_s11 = sshll.u32 (!%p208_p2), %s766_s8, 3 }
  0x26   : > { %s214_s12 = scalar_lea.sflag (!%p208_p2), [#allocation4], %s766_s8  ;;  %s217_s13 = scalar_lea.vmem (!%p208_p2), [#allocation3], %s478_s11 }
  0x2a   : > { %621 = dma.done.wait (%p723_p6), %s214_s12, 128  }
  0x2b   : > { %623 = vsyncadd (%p723_p6), %s214_s12, 4294967168  ;;  %v644_v1 = vmov 1.0   ;;  %v776_v2 = vld [vmem:[%s217_s13] sm:$0xff]  ;;  %vm301_vm0 = vcmask 1043456   ;;  %v245_v9 = vld [vmem:[%s825_s1] sm:$0x1] }
  0x2c   : > { %256 = vmatpush.msra.mxu0 %v644_v1  ;;  %276 = vmatpush.msra.mxu1 %v644_v1  ;;  %251 = vst [vmem:[#allocation1] ss:$2 sm:$0xff] %v776_v2  ;;  %vm297_vm1 = vcmask 31744   ;;  %v246_v10 = vld [vmem:[#allocation2] sm:$0x1]  ;;  %vm330_vm2 = vcmask 1040384  }
  0x2d   : > { %v247_v14 = vld [vmem:[%s827_s3] sm:$0xf]  ;;  %vm326_vm3 = vcmask 7168   ;;  %v645_v15 = vmov 0   ;;  %v646_v32 = vmov 839922192  }
  0x2e   : > { %257 = vmatpush.msra.mxu0 %v644_v1  ;;  %277 = vmatpush.msra.mxu1 %v644_v1  ;;  %v248_v16 = vld [vmem:[%s828_s4] sm:$0xf]  ;;  %v378_v33 = vunpack.c.l.s4 %v646_v32  ;;  %s491_s19 = sshll.u32 %s701_s2, 3  ;;  %s244_s29 = scalar_lea.vmem [#allocation6], %s478_s11 }
  0x2f   : > { %541 = vset.pattern.permute.xlu0 %v645_v15  ;;  %s396_s27 = scalar_lea.hbm %s829_s5, %s491_s19  ;;  %s398_s9 = sshll.u32 %s244_s29, 4  ;;  %s399_s9 = int_to_ptr.vmem [resolvable:$true] %s398_s9 }
  0x30   : > { %258 = vmatpush.msra.mxu0 %v644_v1  ;;  %278 = vmatpush.msra.mxu1 %v644_v1  ;;  %v379_v34 = vunpack.c.0.s8 %v378_v33  ;;  %s400_s10 = sshll.u32 %s396_s27, 4  ;;  %s385_s12 = scalar_lea.sflag [#allocation5], %s766_s8  ;;  %s401_s10 = int_to_ptr.hbm [resolvable:$true] %s400_s10 }
  0x31   : > { %s590_s13 = sshra.s32 %s401_s10, 4  ;;  %s596_s11 = scalar_lea.hbm %s829_s5, 16  ;;  %s591_s13 = int_to_ptr.hbm [resolvable:$true] %s590_s13 }
  0x32   : > { %259 = vmatpush.msra.mxu0 %v644_v1  ;;  %279 = vmatpush.msra.mxu1 %v644_v1  ;;  %s592_s2 = scalar_lea.hbm %s591_s13, 8  ;;  %p597_p0 = scmp.lt.s32.totalorder %s591_s13, %s829_s5 }
  0x33   : > { %v252_v3 = vld.sshfl [vmem:[#allocation1] sm:$0xff pattern:$0x75316420]  ;;  %v253_v4 = vld.sshfl [vmem:[#allocation1 + $0x8] sm:$0xff pattern:$0x75316420]  ;;  %p593_p6 = scmp.ne.s32.totalorder %s591_s13, %s592_s2  ;;  %p598_p1 = scmp.lt.s32.totalorder %s596_s11, %s592_s2 }
  0x34   : > { %260 = vmatpush.msra.mxu0 %v644_v1  ;;  %280 = vmatpush.msra.mxu1 %v644_v1 }
  0x35   : > { %p594_p9 = pnand %p593_p6, %p730_p11  ;;  %p599_p3 = por %p598_p1, %p597_p0 }
  0x36   : > { %261 = vmatpush.msra.mxu0 %v644_v1  ;;  %281 = vmatpush.msra.mxu1 %v644_v1 }
  0x37   : > { %p595_p13 = pneg %p594_p9 }
  0x38   : > { %262 = vmatpush.msra.mxu0 %v644_v1  ;;  %282 = vmatpush.msra.mxu1 %v644_v1 }
  0x39   : > { %p600_p4 = pnand %p599_p3, %p595_p13 }
  0x3a   : > { %263 = vmatpush.msra.mxu0 %v644_v1  ;;  %283 = vmatpush.msra.mxu1 %v644_v1 }
  0x3c   : > { %264 = vmatpush.msra.mxu0 %v644_v1  ;;  %284 = vmatpush.msra.mxu1 %v644_v1 }
  0x3e   : > { %265 = vmatpush.msra.mxu0 %v644_v1  ;;  %285 = vmatpush.msra.mxu1 %v644_v1 }
  0x40   : > { %266 = vmatpush.msra.mxu0 %v644_v1  ;;  %286 = vmatpush.msra.mxu1 %v644_v1 }
  0x42   : > { %267 = vmatpush.msra.mxu0 %v644_v1  ;;  %287 = vmatpush.msra.mxu1 %v644_v1 }
  0x44   : > { %268 = vmatpush.msra.mxu0 %v644_v1  ;;  %288 = vmatpush.msra.mxu1 %v644_v1 }
  0x46   : > { %269 = vmatpush.msra.mxu0 %v644_v1  ;;  %289 = vmatpush.msra.mxu1 %v644_v1 }
  0x48   : > { %270 = vmatpush.msra.mxu0 %v644_v1  ;;  %290 = vmatpush.msra.mxu1 %v644_v1 }
  0x4a   : > { %271 = vmatpush.msra.mxu0 %v644_v1  ;;  %291 = vmatpush.msra.mxu1 %v644_v1 }
  0x4b   : > { %272 = vmatmul.f32.vlgmr.msra.gmra.mxu0 %v252_v3  ;;  %292 = vmatmul.f32.vlgmr.msra.gmra.mxu1 %v253_v4 }
  0xc8   : > { %v273_v5 = vpop.f32.mrf.mxu0  ;;  %v293_v6 = vpop.f32.mrf.mxu1 }
  0xc9   : > { %v294_v7 = vadd.f32 %v293_v6, %v273_v5 }
  0xcb   : > { %v296_v8 = vmul.f32 0.00390625, %v294_v7 }
  0xcd   : > { %480 = vmatpush.msk.msra.mxu2 %vm301_vm0, %v296_v8 }
  0xce   : > { %481 = vmatmul.msk.f32.vlgmr.msra.gmra.mxu2 %vm297_vm1, %v245_v9 }
 0x151   : > { %v322_v11 = vpop.f32.mrf.mxu2 }
 0x152   : > { %v323_v12 = vadd.f32 %v322_v11, %v246_v10 }
 0x154   : > { %v325_v13 = vmax.f32 %v323_v12, 0.0 }
 0x156   : > { %482 = vmatpush.msk.msra.mxu3 %vm330_vm2, %v325_v13 }
 0x157   : > { %483 = vmatmul.msk.f32.vlgmr.msra.gmra.mxu3 %vm326_vm3, %v247_v14 }
 0x1da   : > { %v351_v17 = vpop.f32.mrf.mxu3 }
 0x1db   : > { %v352_v18 = vadd.f32 %v351_v17, %v248_v16 }
 0x1dd   : > { %v484_v19 = vmul.f32 -1.442695, %v352_v18 }
 0x1df   : > { %542 = vpow2.f32 %v484_v19 }
 0x1e5   : > { %v543_v20 = vpop.eup %542 }
 0x1e6   : > { %v357_v21 = vadd.f32 1.0, %v543_v20 }
 0x1e8   : > { %544 = vrcp.f32 %v357_v21  ;;  %v369_v25 = vand.u32 2147483648, %v357_v21  ;;  %v367_v27 = vand.u32 2147483647, %v357_v21  ;;  %vm363_vm5 = vweird.f32 %v357_v21 }
 0x1ea   : > { %v370_v29 = vor.u32 1.1754944e-38, %v369_v25  ;;  %vm368_vm7 = vcmp.eq.f32.partialorder %v367_v27, 8.507059e+37 }
 0x1ee   : > { %v545_v22 = vpop.eup %544 }
 0x1ef   : > { %v359_v23 = vmul.f32 %v545_v22, %v357_v21  ;;  %vm364_vm4 = vweird.f32 %v545_v22 }
 0x1f0   : > { %vm365_vm6 = vmor %vm363_vm5, %vm364_vm4 }
 0x1f1   : > { %v360_v24 = vsub.f32 1.0, %v359_v23 }
 0x1f3   : > { %v361_v26 = vmul.f32 %v545_v22, %v360_v24 }
 0x1f5   : > { %v362_v28 = vadd.f32 %v545_v22, %v361_v26 }
 0x1f7   : > { %v366_v30 = vsel %vm365_vm6, %v545_v22, %v362_v28 }
 0x1f8   : > { %v371_v31 = vsel %vm368_vm7, %v370_v29, %v366_v30 }
 0x1f9   : > { %375 = vperm.xlu0 %541, %v371_v31  }
 0x26b   : > { %v376_v35 = vpop.permute.xlu0 %375 }
 0x26c   : > { %v380_v36 = vperm.slane %v376_v35, %v379_v34 }
 0x26e   : > { %v382_v37 = vmul.f32 %v380_v36, %v776_v2 }
 0x270   : > { %383 = vst [vmem:[%s244_s29] sm:$0xff] %v382_v37 }
 0x271   : > { %603 = shalt.err (!%p600_p4)
}
 0x272   : > { %494 = dma.vmem_to_hbm [thread:$0]  (%p730_p11), %s399_s9, 128, %s401_s10, %s385_s12  }
 0x273 PF: > { %s412_s8 = sand.u32 1, %s630_s20   ;;  %p835_p7 = scmp.ge.s32.totalorder %s642_s23, 2 }
 0x274   : > { %s413_s17 = scalar_lea.sflag [#allocation5], %s412_s8 }
 0x275   : > { %p501_p5 = pnand %p835_p7, %p734_p12 }
 0x277   : > { %p502_p8 = pneg %p501_p5 }
 0x279   : > { %625 = dma.done.wait (%p502_p8), %s413_s17, 128  }
 0x27a   : > { %627 = vsyncadd (%p502_p8), %s413_s17, 4294967168  ;;  %p20_p10 = scmp.ge.s32.totalorder %s705_s25, 4   ;;  %s836_s20 = smov %s634_s21 }
 0x27b   : > { %s837_s21 = smov %s638_s22  ;;  %s838_s22 = smov %s717_s28 }
 0x27c   : > { %s839_s23 = smov %s705_s25  ;;  %22 = sbr.rel (!%p20_p10) target bundleno = 8 (0x8), region = 85 }
 0x281   :  { %419 = vsyncpa [#allocation4], 1 }
 0x282   :  { %421 = vsyncpa [#allocation4 + $0x1], 1 }
 0x283   :  { %422 = vsyncpa [#allocation5], 1 }
 0x284   :  { %424 = vsyncpa [#allocation5 + $0x1], 1 }

</bundles_post_ra>
